<compile_context>
chip_gen: v5e
topology: v5e:2x2
jax: 0.10.0
libtpu: 0.0.40
codegen_flags: <defaults>
</compile_context>

<pallas_src>
import functools
import math

import jax
import jax.numpy as jnp
from jax.experimental import pallas as pl
from jax.experimental.pallas import tpu as pltpu

_SQRT2 = math.sqrt(2.0)


def _feature_selector_kernel(xt_ref, w1t_ref, b1_ref, w2t_ref, b2_ref,
                             eps_ref, out_ref, *, d, with_reg):
    """One (D, TILE_N) column tile of the fused FeatureSelector forward.

    Feature-major inputs: xt (D, TN), W1^T (H, D), W2^T (D, H), biases/eps as
    (., 1) columns.  Output is a packed lane-dense slab:
      rows [0:D)   = stochastic gate
      rows [D:2D)  = mu
      rows [2D:3D) = hard_sigmoid(mu)
      rows [3D:4D) = regularizer            (only if with_reg)
    """
    xt = xt_ref[...]                                                  # (D, TN) f32

    # Selector MLP (dropout == identity in eval mode), f32 end to end.
    h = jnp.dot(w1t_ref[...], xt,
                preferred_element_type=jnp.float32) + b1_ref[...]    # (H, TN)
    h = jnp.maximum(h, 0.0)                                          # ReLU
    mu = jnp.dot(w2t_ref[...], h,
                 preferred_element_type=jnp.float32)
    mu = 0.5 * (mu + b2_ref[...])                                    # (D, TN)

    sigma = jnp.float32(0.5)
    t = mu + jnp.float32(0.5)                      # mu + shift (shared subexpr)

    gate = jnp.clip(t + sigma * eps_ref[...], 0.0, 1.0)   # hard_sigmoid(mu + sigma*eps)
    hs_mu = jnp.clip(t, 0.0, 1.0)                          # hard_sigmoid(mu)

    out_ref[0 * d:1 * d, :] = gate
    out_ref[1 * d:2 * d, :] = mu
    out_ref[2 * d:3 * d, :] = hs_mu
    if with_reg:
        # Phi((mu + shift)/sigma) = 0.5 * (1 + erf(sqrt(2) * t))
        reg = 0.5 * (1.0 + jax.lax.erf(t * jnp.float32(_SQRT2)))
        out_ref[3 * d:4 * d, :] = reg


def _round_up(v, m):
    return ((v + m - 1) // m) * m


def _pick_tile(n, tile_n):
    """Lane tile along the flattened row axis (multiple of 128, <= tile_n).

    Small N  -> one big step (splitting a serial grid only adds ~0.35us/step).
    Large N  -> >= 4 steps (2 per TensorCore on dual-TC v7x) so every core
                keeps its input/output DMAs double-buffered, with ceil-to-128
                sizing instead of power-of-2 (no padded-tail waste).
    """
    tile_n = max(128, (int(tile_n) // 128) * 128)
    n128 = _round_up(max(int(n), 1), 128)
    if n128 <= 4 * 1024:
        return min(tile_n, n128)
    steps = max(4, pl.cdiv(n128, tile_n))
    return min(tile_n, max(1024, _round_up(pl.cdiv(n128, steps), 128)))


def _vmem_limit_bytes(d, h, tile, rows):
    """Scoped-VMEM request: double-buffered in/out tiles + intermediates,
    with 2x headroom, clamped to [32 MiB, 64 MiB] (v7x-safe)."""
    est = 4 * tile * (2 * d + 2 * rows * d + h + 4 * d) + (1 << 20)
    return int(min(max(2 * est, 32 << 20), 64 << 20))


@functools.partial(jax.jit, static_argnames=("tile_n", "with_reg"))
def feature_selector_forward(x, w1, b1, w2, b2, eps, *, tile_n=16384,
                             with_reg=True):
    """x: (B, L, D) float32; w1: (D, H), w2: (H, D) (i.e. torch weight.T).

    Returns (stochastic_gate, regularizer, (mu, hs_mu), hs_mu), each (B, L, D),
    matching the PyTorch forward's 4-tuple.  regularizer is None if
    with_reg=False (inference-only fast path)."""
    B, L, D = x.shape
    H = w1.shape[1]
    N = B * L
    rows = 4 if with_reg else 3

    tile = _pick_tile(N, tile_n)
    n_pad = pl.cdiv(N, tile) * tile
    grid = (n_pad // tile,)

    # Feature-major (lane-dense) plumbing: big N axis -> 128-lane dim.
    # Pad + transpose fuse into a single copy in the wrapper.
    x2 = x.reshape(N, D).astype(jnp.float32)
    xt = jnp.pad(x2, ((0, n_pad - N), (0, 0))).T              # (D, n_pad)

    w1t = w1.T.astype(jnp.float32)                            # (H, D)
    w2t = w2.T.astype(jnp.float32)                            # (D, H)
    b1c = b1.reshape(H, 1).astype(jnp.float32)
    b2c = b2.reshape(D, 1).astype(jnp.float32)
    epsc = eps.reshape(D, 1).astype(jnp.float32)

    col_spec = pl.BlockSpec((D, tile), lambda i: (0, i))
    full = lambda shape: pl.BlockSpec(shape, lambda i: (0, 0))

    out = pl.pallas_call(
        functools.partial(_feature_selector_kernel, d=D, with_reg=with_reg),
        out_shape=jax.ShapeDtypeStruct((rows * D, n_pad), jnp.float32),
        grid=grid,
        in_specs=[
            col_spec,          # xT tile  (D, tile)
            full((H, D)),      # W1^T     (resident across grid)
            full((H, 1)),      # b1
            full((D, H)),      # W2^T
            full((D, 1)),      # b2
            full((D, 1)),      # eps
        ],
        out_specs=pl.BlockSpec((rows * D, tile), lambda i: (0, i)),
        compiler_params=pltpu.CompilerParams(
            dimension_semantics=("parallel",),
            vmem_limit_bytes=_vmem_limit_bytes(D, H, tile, rows)),
    )(xt, w1t, b1c, w2t, b2c, epsc)

    # ONE transpose of the whole packed slab; the per-output column slices
    # below fuse into it (vs three separate slice+transpose round-trips).
    slab = out[:, :N].T                                       # (N, rows*D)
    gate = slab[:, 0 * D:1 * D].reshape(B, L, D)
    mu = slab[:, 1 * D:2 * D].reshape(B, L, D)
    hs_mu = slab[:, 2 * D:3 * D].reshape(B, L, D)
    reg = slab[:, 3 * D:4 * D].reshape(B, L, D) if with_reg else None

    # PyTorch returns (stochastic_gate, regularizer(), get_gates(), hard_sigmoid(mu))
    # with get_gates() == (mu, clip(mu + 0.5, 0, 1)).
    return gate, reg, (mu, hs_mu), hs_mu


if __name__ == "__main__":
    # Config: enc_in (feature dim) = 8, actor_h_dim = 32, batch = 2, seq = 8.
    B, L, D, H = 2, 8, 8, 32

    key = jax.random.PRNGKey(0)
    kx, kw1, kb1, kw2, kb2, keps = jax.random.split(key, 6)

    x = jax.random.normal(kx, (B, L, D), dtype=jnp.float32)

    # Deterministic parameter init (PyTorch-Linear-style uniform bounds).
    bound1 = 1.0 / math.sqrt(D)
    bound2 = 1.0 / math.sqrt(H)
    w1 = jax.random.uniform(kw1, (D, H), minval=-bound1, maxval=bound1,
                            dtype=jnp.float32)
    b1 = jax.random.uniform(kb1, (H,), minval=-bound1, maxval=bound1,
                            dtype=jnp.float32)
    w2 = jax.random.uniform(kw2, (H, D), minval=-bound2, maxval=bound2,
                            dtype=jnp.float32)
    b2 = jax.random.uniform(kb2, (D,), minval=-bound2, maxval=bound2,
                            dtype=jnp.float32)
    # eps ~ N(0,1) per feature (fresh per forward in PyTorch via eps.normal_()).
    eps = jax.random.normal(keps, (D,), dtype=jnp.float32)

    gate, reg, gates, hs_mu = feature_selector_forward(x, w1, b1, w2, b2, eps)
    jax.block_until_ready((gate, reg, gates[0], gates[1], hs_mu))

    # Plain-JAX f32 reference (high-precision matmuls) of the same forward.
    hp = jax.lax.Precision.HIGHEST
    x2 = x.reshape(-1, D)
    h_ref = jnp.maximum(jnp.dot(x2, w1, precision=hp) + b1, 0.0)
    mu_ref = 0.5 * (jnp.dot(h_ref, w2, precision=hp) + b2)
    gate_ref = jnp.clip(mu_ref + 0.5 * eps[None, :] + 0.5, 0.0, 1.0).reshape(B, L, D)
    reg_ref = (0.5 * (1.0 + jax.lax.erf(((mu_ref + 0.5) / 0.5) /
                                        jnp.sqrt(2.0)))).reshape(B, L, D)
    hsmu_ref = jnp.clip(mu_ref + 0.5, 0.0, 1.0).reshape(B, L, D)

    assert jnp.allclose(gate, gate_ref, atol=5e-3)
    assert jnp.allclose(reg, reg_ref, atol=5e-3)
    assert jnp.allclose(gates[0], mu_ref.reshape(B, L, D), atol=5e-3)
    assert jnp.allclose(gates[1], hsmu_ref, atol=5e-3)
    assert jnp.allclose(hs_mu, hsmu_ref, atol=5e-3)

    print("KERNEL_OK")
</pallas_src>

<mosaic_0001>
module attributes {stable_mosaic.version = 11 : i64} {
  func.func @_feature_selector_kernel(%arg0: i32, %arg1: memref<8x128xf32, #tpu.memory_space<vmem>>, %arg2: memref<32x8xf32, #tpu.memory_space<vmem>>, %arg3: memref<32x1xf32, #tpu.memory_space<vmem>>, %arg4: memref<8x32xf32, #tpu.memory_space<vmem>>, %arg5: memref<8x1xf32, #tpu.memory_space<vmem>>, %arg6: memref<8x1xf32, #tpu.memory_space<vmem>>, %arg7: memref<32x128xf32, #tpu.memory_space<vmem>>) attributes {dimension_semantics = [#tpu.dimension_semantics<parallel>], iteration_bounds = array<i64: 1>, scalar_prefetch = 0 : i64, scratch_operands = 0 : i64, tpu.core_type = #tpu.core_type<tc>, window_params = [{transform_indices = @transform_0, window_bounds = array<i64: 8, 128>}, {pipeline_mode = #tpu.pipeline_mode<synchronous>, transform_indices = @transform_1, window_bounds = array<i64: 32, 8>}, {pipeline_mode = #tpu.pipeline_mode<synchronous>, transform_indices = @transform_2, window_bounds = array<i64: 32, 1>}, {pipeline_mode = #tpu.pipeline_mode<synchronous>, transform_indices = @transform_3, window_bounds = array<i64: 8, 32>}, {pipeline_mode = #tpu.pipeline_mode<synchronous>, transform_indices = @transform_4, window_bounds = array<i64: 8, 1>}, {pipeline_mode = #tpu.pipeline_mode<synchronous>, transform_indices = @transform_5, window_bounds = array<i64: 8, 1>}, {transform_indices = @transform_6, window_bounds = array<i64: 32, 128>}]} {
    %c0 = arith.constant 0 : index
    %c0_0 = arith.constant 0 : index
    %0 = vector.load %arg1[%c0, %c0_0] : memref<8x128xf32, #tpu.memory_space<vmem>>, vector<8x128xf32>
    %c0_1 = arith.constant 0 : index
    %c0_2 = arith.constant 0 : index
    %1 = vector.load %arg2[%c0_1, %c0_2] : memref<32x8xf32, #tpu.memory_space<vmem>>, vector<32x8xf32>
    %cst = arith.constant dense<0.000000e+00> : vector<32x128xf32>
    %2 = tpu.matmul %1, %0, %cst {dimension_numbers = #tpu.dot_dimension_numbers<[1], [0], [0], [1], [0, 0, 1, 1], [], []>} : vector<32x8xf32>, vector<8x128xf32>, vector<32x128xf32> -> vector<32x128xf32>
    %c0_3 = arith.constant 0 : index
    %c0_4 = arith.constant 0 : index
    %3 = vector.load %arg3[%c0_3, %c0_4] : memref<32x1xf32, #tpu.memory_space<vmem>>, vector<32x1xf32>
    %4 = vector.broadcast %3 : vector<32x1xf32> to vector<32x128xf32>
    %5 = arith.addf %2, %4 : vector<32x128xf32>
    %cst_5 = arith.constant 0.000000e+00 : f32
    %6 = vector.broadcast %cst_5 : f32 to vector<32x128xf32>
    %7 = arith.maximumf %5, %6 : vector<32x128xf32>
    %c0_6 = arith.constant 0 : index
    %c0_7 = arith.constant 0 : index
    %8 = vector.load %arg4[%c0_6, %c0_7] : memref<8x32xf32, #tpu.memory_space<vmem>>, vector<8x32xf32>
    %cst_8 = arith.constant dense<0.000000e+00> : vector<8x128xf32>
    %9 = tpu.matmul %8, %7, %cst_8 {dimension_numbers = #tpu.dot_dimension_numbers<[1], [0], [0], [1], [0, 0, 1, 1], [], []>} : vector<8x32xf32>, vector<32x128xf32>, vector<8x128xf32> -> vector<8x128xf32>
    %c0_9 = arith.constant 0 : index
    %c0_10 = arith.constant 0 : index
    %10 = vector.load %arg5[%c0_9, %c0_10] : memref<8x1xf32, #tpu.memory_space<vmem>>, vector<8x1xf32>
    %11 = vector.broadcast %10 : vector<8x1xf32> to vector<8x128xf32>
    %12 = arith.addf %9, %11 : vector<8x128xf32>
    %cst_11 = arith.constant 5.000000e-01 : f32
    %13 = vector.broadcast %cst_11 : f32 to vector<8x128xf32>
    %14 = arith.mulf %13, %12 : vector<8x128xf32>
    %cst_12 = arith.constant 5.000000e-01 : f32
    %15 = vector.broadcast %cst_12 : f32 to vector<8x128xf32>
    %16 = arith.addf %14, %15 : vector<8x128xf32>
    %c0_13 = arith.constant 0 : index
    %c0_14 = arith.constant 0 : index
    %17 = vector.load %arg6[%c0_13, %c0_14] : memref<8x1xf32, #tpu.memory_space<vmem>>, vector<8x1xf32>
    %cst_15 = arith.constant 5.000000e-01 : f32
    %18 = vector.broadcast %cst_15 : f32 to vector<8x1xf32>
    %19 = arith.mulf %18, %17 : vector<8x1xf32>
    %20 = vector.broadcast %19 : vector<8x1xf32> to vector<8x128xf32>
    %21 = arith.addf %16, %20 : vector<8x128xf32>
    %cst_16 = arith.constant 0.000000e+00 : f32
    %cst_17 = arith.constant 1.000000e+00 : f32
    %22 = vector.broadcast %cst_16 : f32 to vector<8x128xf32>
    %23 = arith.maximumf %22, %21 : vector<8x128xf32>
    %24 = vector.broadcast %cst_17 : f32 to vector<8x128xf32>
    %25 = arith.minimumf %24, %23 : vector<8x128xf32>
    %cst_18 = arith.constant 0.000000e+00 : f32
    %cst_19 = arith.constant 1.000000e+00 : f32
    %26 = vector.broadcast %cst_18 : f32 to vector<8x128xf32>
    %27 = arith.maximumf %26, %16 : vector<8x128xf32>
    %28 = vector.broadcast %cst_19 : f32 to vector<8x128xf32>
    %29 = arith.minimumf %28, %27 : vector<8x128xf32>
    %c0_20 = arith.constant 0 : index
    %c0_21 = arith.constant 0 : index
    %30 = vector.load %arg7[%c0_20, %c0_21] : memref<32x128xf32, #tpu.memory_space<vmem>>, vector<8x128xf32>
    tpu.vector_store %arg7[%c0_20, %c0_21], %25 {strides = array<i32>} : memref<32x128xf32, #tpu.memory_space<vmem>>, vector<8x128xf32>,
    %c8 = arith.constant 8 : index
    %c0_22 = arith.constant 0 : index
    %31 = vector.load %arg7[%c8, %c0_22] : memref<32x128xf32, #tpu.memory_space<vmem>>, vector<8x128xf32>
    tpu.vector_store %arg7[%c8, %c0_22], %14 {strides = array<i32>} : memref<32x128xf32, #tpu.memory_space<vmem>>, vector<8x128xf32>,
    %c16 = arith.constant 16 : index
    %c0_23 = arith.constant 0 : index
    %32 = vector.load %arg7[%c16, %c0_23] : memref<32x128xf32, #tpu.memory_space<vmem>>, vector<8x128xf32>
    tpu.vector_store %arg7[%c16, %c0_23], %29 {strides = array<i32>} : memref<32x128xf32, #tpu.memory_space<vmem>>, vector<8x128xf32>,
    %cst_24 = arith.constant 1.41421354 : f32
    %33 = vector.broadcast %cst_24 : f32 to vector<8x128xf32>
    %34 = arith.mulf %16, %33 : vector<8x128xf32>
    %35 = math.erf %34 : vector<8x128xf32>
    %cst_25 = arith.constant 1.000000e+00 : f32
    %36 = vector.broadcast %cst_25 : f32 to vector<8x128xf32>
    %37 = arith.addf %36, %35 : vector<8x128xf32>
    %cst_26 = arith.constant 5.000000e-01 : f32
    %38 = vector.broadcast %cst_26 : f32 to vector<8x128xf32>
    %39 = arith.mulf %38, %37 : vector<8x128xf32>
    %c24 = arith.constant 24 : index
    %c0_27 = arith.constant 0 : index
    %40 = vector.load %arg7[%c24, %c0_27] : memref<32x128xf32, #tpu.memory_space<vmem>>, vector<8x128xf32>
    tpu.vector_store %arg7[%c24, %c0_27], %39 {strides = array<i32>} : memref<32x128xf32, #tpu.memory_space<vmem>>, vector<8x128xf32>,
    return
  }
  func.func @transform_0(%arg0: i32) -> (i32, i32) {
    %c0_i32 = arith.constant 0 : i32
    %c0_i32_0 = arith.constant 0 : i32
    return %c0_i32, %arg0 : i32, i32
  }
  func.func @transform_1(%arg0: i32) -> (i32, i32) {
    %c0_i32 = arith.constant 0 : i32
    %c0_i32_0 = arith.constant 0 : i32
    %c0_i32_1 = arith.constant 0 : i32
    return %c0_i32, %c0_i32_0 : i32, i32
  }
  func.func @transform_2(%arg0: i32) -> (i32, i32) {
    %c0_i32 = arith.constant 0 : i32
    %c0_i32_0 = arith.constant 0 : i32
    %c0_i32_1 = arith.constant 0 : i32
    return %c0_i32, %c0_i32_0 : i32, i32
  }
  func.func @transform_3(%arg0: i32) -> (i32, i32) {
    %c0_i32 = arith.constant 0 : i32
    %c0_i32_0 = arith.constant 0 : i32
    %c0_i32_1 = arith.constant 0 : i32
    return %c0_i32, %c0_i32_0 : i32, i32
  }
  func.func @transform_4(%arg0: i32) -> (i32, i32) {
    %c0_i32 = arith.constant 0 : i32
    %c0_i32_0 = arith.constant 0 : i32
    %c0_i32_1 = arith.constant 0 : i32
    return %c0_i32, %c0_i32_0 : i32, i32
  }
  func.func @transform_5(%arg0: i32) -> (i32, i32) {
    %c0_i32 = arith.constant 0 : i32
    %c0_i32_0 = arith.constant 0 : i32
    %c0_i32_1 = arith.constant 0 : i32
    return %c0_i32, %c0_i32_0 : i32, i32
  }
  func.func @transform_6(%arg0: i32) -> (i32, i32) {
    %c0_i32 = arith.constant 0 : i32
    %c0_i32_0 = arith.constant 0 : i32
    return %c0_i32, %arg0 : i32, i32
  }
}

</mosaic_0001>

<bundles_post_ra>
// kernel: feature_selector_forward.1
= control target key start
LH: loop header
LB: loop body
LE: loop exit
PB: predicated region body
PF: predicated region fallthrough
CT: control target
= control target key end

     0   :  { %vm52_vm0 = vcmask 64512   ;;  %v208_v3 = vmov 0   ;;  %vm105_vm1 = vcmask 261120   ;;  %s296_s0 = inlined_call_operand.vmem [shape: f32[8,128], index: 0, kind: input, shape index: {}]   ;;  %s297_s1 = inlined_call_operand.vmem [shape: f32[32,8], index: 1, kind: input, shape index: {}]   ;;  %s298_s2 = inlined_call_operand.vmem [shape: f32[32,1], index: 2, kind: input, shape index: {}]   ;;  %s299_s4 = inlined_call_operand.vmem [shape: f32[8,1], index: 4, kind: input, shape index: {}]   ;;  %s300_s5 = inlined_call_operand.vmem [shape: f32[8,1], index: 5, kind: input, shape index: {}]   ;;  %s301_s3 = inlined_call_operand.vmem [shape: f32[8,32], index: 3, kind: input, shape index: {}]   ;;  %s302_s6 = inlined_call_operand.vmem [shape: f32[32,128], index: 6, kind: output, shape index: {}]  }
   0x1   :  { %v23_v0 = vld [vmem:[%s296_s0] sm:$0xff]  ;;  %v25_v1 = vld [vmem:[%s297_s1 + $0x8] sm:$0xff]  ;;  %v27_v2 = vld [vmem:[%s297_s1 + $0x18] sm:$0xff]  ;;  %203 = vset.pattern.permute.xlu0 %v208_v3  ;;  %204 = vset.pattern.permute.xlu1 %v208_v3 }
   0x2   :  { %200 = vmatpush.msra.mxu2 %v23_v0  ;;  %201 = vmatpush.msra.mxu3 %v23_v0  ;;  %v31_v4 = vld [vmem:[%s298_s2 + $0x18] sm:$0xff]  ;;  %v24_v5 = vld [vmem:[%s297_s1] sm:$0xff]  ;;  %v29_v6 = vld [vmem:[%s298_s2 + $0x8] sm:$0xff] }
   0x3   :  { %195 = vmatmul.msk.f32.vlgmr.msra.gmra.mxu2 %vm52_vm0, %v25_v1  ;;  %197 = vmatmul.msk.f32.vlgmr.msra.gmra.mxu3 %vm52_vm0, %v27_v2  ;;  %v26_v7 = vld [vmem:[%s297_s1 + $0x10] sm:$0xff]  ;;  %v28_v9 = vld [vmem:[%s298_s2] sm:$0xff] }
   0x4   :  { %49 = vperm.xlu0 %203, %v31_v4   ;;  %80 = vmatpush.msra.mxu0 %v23_v0  ;;  %v30_v8 = vld [vmem:[%s298_s2 + $0x10] sm:$0xff]  ;;  %v99_v10 = vld [vmem:[%s299_s4] sm:$0xff] }
   0x5   :  { %194 = vmatmul.msk.f32.vlgmr.msra.gmra.mxu0 %vm52_vm0, %v24_v5  ;;  %39 = vperm.xlu1 %204, %v29_v6   ;;  %v131_v11 = vld [vmem:[%s300_s5] sm:$0xff] }
   0x6   :  { %205 = vset.pattern.permute.xlu2 %v208_v3  ;;  %v132_v12 = vmul.f32 0.5, %v131_v11  ;;  %v98_v29 = vld [vmem:[%s301_s3] sm:$0xff] }
   0x7   :  { %102 = vperm.xlu2 %205, %v99_v10  }
   0xb   :  { %196 = vmatmul.msk.f32.gmra.mxu2 %vm52_vm0, %v26_v7 }
   0xc   :  { %44 = vperm.xlu0 %203, %v30_v8  }
   0xd   :  { %34 = vperm.xlu1 %204, %v28_v9  }
   0xf   :  { %135 = vperm.xlu2 %205, %v132_v12  }
  0x61   :  { %v103_v30 = vpop.permute.xlu2 %102 }
  0x69   :  { %v136_v35 = vpop.permute.xlu2 %135 }
  0x76   :  { %v50_v13 = vpop.permute.xlu0 %49 }
  0x77   :  { %v40_v14 = vpop.permute.xlu1 %39 }
  0x7e   :  { %v45_v19 = vpop.permute.xlu0 %44 }
  0x7f   :  { %v35_v20 = vpop.permute.xlu1 %34 }
  0x82   :  { %v82_v21 = vpop.f32.mrf.mxu0 }
  0x83   :  { %v83_v25 = vadd.f32 %v82_v21, %v35_v20 }
  0x85   :  { %v94_v28 = vmax.f32 %v83_v25, 0.0 }
  0x86   :  { %v85_v15 = vpop.f32.mrf.mxu2  ;;  %v91_v16 = vpop.f32.mrf.mxu3 }
  0x87   :  { %v92_v17 = vadd.f32 %v91_v16, %v50_v13  ;;  %v86_v23 = vadd.f32 %v85_v15, %v40_v14 }
  0x89   :  { %v97_v18 = vmax.f32 %v92_v17, 0.0  ;;  %v95_v27 = vmax.f32 %v86_v23, 0.0 }
  0x8b   :  { %121 = vmatpush.msra.mxu1 %v97_v18 }
  0x8e   :  { %v88_v22 = vpop.f32.mrf.mxu2 }
  0x8f   :  { %v89_v24 = vadd.f32 %v88_v22, %v45_v19 }
  0x91   :  { %v96_v26 = vmax.f32 %v89_v24, 0.0 }
  0x93   :  { %122 = vmatpush.msra.mxu1 %v96_v26 }
  0x95   :  { %123 = vmatpush.msra.mxu1 %v95_v27 }
  0x97   :  { %124 = vmatpush.msra.mxu1 %v94_v28 }
  0x98   :  { %198 = vmatmul.msk.f32.vlgmr.msra.gmra.mxu1 %vm105_vm1, %v98_v29 }
 0x115   :  { %v126_v31 = vpop.f32.mrf.mxu1 }
 0x116   :  { %v127_v32 = vadd.f32 %v126_v31, %v103_v30 }
 0x118   :  { %v129_v33 = vmul.f32 0.5, %v127_v32 }
 0x11a   :  { %v130_v34 = vadd.f32 0.5, %v129_v33  ;;  %144 = vst [vmem:[%s302_s6 + $0x8] sm:$0xff] %v129_v33 }
 0x11c   :  { %v138_v36 = vadd.f32 %v136_v35, %v130_v34  ;;  %v141_v37 = vmax.f32 %v130_v34, 0.0  ;;  %v146_v38 = vmul.f32 1.4142135, %v130_v34 }
 0x11e   :  { %v139_v39 = vmax.f32 %v138_v36, 0.0  ;;  %v142_v40 = vmin.f32 %v141_v37, 1.0  ;;  %v147_v41 = vmul.f32 %v146_v38, %v146_v38 }
 0x120   :  { %v140_v42 = vmin.f32 %v139_v39, 1.0  ;;  %145 = vst [vmem:[%s302_s6 + $0x10] sm:$0xff] %v142_v40  ;;  %v148_v43 = vmin.f32 %v147_v41, 16.0 }
 0x122   :  { %143 = vst [vmem:[%s302_s6] sm:$0xff] %v140_v42  ;;  %v149_v44 = vmul.f32 2.1237322e-06, %v148_v43  ;;  %v160_v45 = vmul.f32 3.8918573e-05, %v148_v43 }
 0x124   :  { %v150_v46 = vadd.f32 0.00028619796, %v149_v44  ;;  %v161_v47 = vadd.f32 0.001143296, %v160_v45 }
 0x126   :  { %v151_v48 = vmul.f32 %v150_v46, %v148_v43  ;;  %v162_v49 = vmul.f32 %v161_v47, %v148_v43 }
 0x128   :  { %v163_v50 = vadd.f32 0.014752088, %v162_v49  ;;  %v152_v51 = vadd.f32 0.0036580483, %v151_v48 }
 0x12a   :  { %v164_v52 = vmul.f32 %v163_v50, %v148_v43  ;;  %v153_v54 = vmul.f32 %v152_v51, %v148_v43 }
 0x12c   :  { %v165_v53 = vadd.f32 0.112945676, %v164_v52  ;;  %v154_v57 = vadd.f32 0.05243302, %v153_v54 }
 0x12e   :  { %v166_v55 = vmul.f32 %v165_v53, %v148_v43  ;;  %v155_v60 = vmul.f32 %v154_v57, %v148_v43 }
 0x130   :  { %v167_v56 = vadd.f32 0.4994258, %v166_v55  ;;  %v156_v61 = vadd.f32 0.18741608, %v155_v60 }
 0x132   :  { %v168_v58 = vmul.f32 %v167_v56, %v148_v43  ;;  %v157_v63 = vmul.f32 %v156_v61, %v148_v43 }
 0x134   :  { %v169_v59 = vadd.f32 1.0, %v168_v58  ;;  %v158_v3 = vadd.f32 1.1283791, %v157_v63 }
 0x136   :  { %206 = vrcp.f32 %v169_v59  ;;  %v181_v2 = vand.u32 2147483648, %v169_v59  ;;  %v179_v5 = vand.u32 2147483647, %v169_v59  ;;  %vm175_vm3 = vweird.f32 %v169_v59 }
 0x137   :  { %v159_v8 = vmul.f32 %v158_v3, %v146_v38 }
 0x138   :  { %v182_v7 = vor.u32 1.1754944e-38, %v181_v2  ;;  %vm180_vm5 = vcmp.eq.f32.partialorder %v179_v5, 8.507059e+37 }
 0x13c   :  { %v207_v62 = vpop.eup %206 }
 0x13d   :  { %v171_v0 = vmul.f32 %v207_v62, %v169_v59  ;;  %vm176_vm2 = vweird.f32 %v207_v62 }
 0x13e   :  { %vm177_vm4 = vmor %vm175_vm3, %vm176_vm2 }
 0x13f   :  { %v172_v1 = vsub.f32 1.0, %v171_v0 }
 0x141   :  { %v173_v4 = vmul.f32 %v207_v62, %v172_v1 }
 0x143   :  { %v174_v6 = vadd.f32 %v207_v62, %v173_v4 }
 0x145   :  { %v178_v9 = vsel %vm177_vm4, %v207_v62, %v174_v6 }
 0x146   :  { %v183_v10 = vsel %vm180_vm5, %v182_v7, %v178_v9 }
 0x147   :  { %v184_v11 = vmul.f32 %v183_v10, %v159_v8 }
 0x149   :  { %v199_v12 = vclamps-f32 %v184_v11, 1.0 }
 0x14b   :  { %v187_v13 = vadd.f32 1.0, %v199_v12 }
 0x14d   :  { %v188_v14 = vmul.f32 0.5, %v187_v13 }
 0x14f   :  { %189 = vst [vmem:[%s302_s6 + $0x18] sm:$0xff] %v188_v14 }

</bundles_post_ra>
